<compile_context>
chip_gen: v7x
topology: tpu7x:2x2x1
jax: 0.10.0
libtpu: 0.0.40
codegen_flags: <defaults>
</compile_context>

<pallas_src>
import functools

import jax
import jax.numpy as jnp
from jax.experimental import pallas as pl
from jax.experimental.pallas import tpu as pltpu


def _round_up(v, m):
    return ((v + m - 1) // m) * m


def tq_kernel(xa_ref, w1_ref, b1_ref, w2_ref, b2_ref, w3_ref, b3_ref, out_ref):
    mxu_dtype = w1_ref.dtype  # bf16 (default) or f32

    # Stage 1: [relu(fc1(x)) | relu(skip_fc2(a)) | 0-pad]   -- one MXU dot.
    xa = xa_ref[...].astype(mxu_dtype)
    h1 = jnp.dot(xa, w1_ref[...], preferred_element_type=jnp.float32)
    h1 = jnp.maximum(h1 + b1_ref[...], 0.0)

    # Stage 2: [relu(fc2(h1)) | ha | 0-pad]   -- fc2 block + identity block,
    # so the (already >= 0) skip activations ride through unchanged.
    cat = jnp.dot(h1.astype(mxu_dtype), w2_ref[...],
                  preferred_element_type=jnp.float32)
    cat = jnp.maximum(cat + b2_ref[...], 0.0)

    # Stage 3: skip_fc3 over the fused concat.
    out = jnp.dot(cat.astype(mxu_dtype), w3_ref[...],
                  preferred_element_type=jnp.float32)
    out_ref[...] = (out + b3_ref[...]).astype(out_ref.dtype)


def prepare_params(p, compute_dtype=jnp.bfloat16):
    """One-time weight prep (call once, reuse across forward calls).

    * fc1 and skip_fc2 are packed block-diagonally into one (state_dim+1, HPAD)
      matrix so a single dot over the packed [x, a] input yields both fc1(x)
      (lanes [0,H)) and skip_fc2(a) (lanes [H,H+10)).
    * fc2 gets a 10x10 identity block on lanes [H,H+10) so the skip activations
      pass through stage 2 unchanged.
    * Lane dims are zero-padded to a multiple of 128 (exact zeros -> results
      unchanged, Mosaic emits unmasked full-width ops).
    * Matmul weights stored in `compute_dtype` (bf16 default); biases stay f32.
    """
    H, state_dim = p["fc1_w"].shape
    HP = H + 10
    HPAD = _round_up(HP, 128)
    skip_dim = p["skip_fc3_w"].shape[0]

    w1 = jnp.zeros((state_dim + 1, HPAD), jnp.float32)
    w1 = w1.at[:state_dim, :H].set(p["fc1_w"].T)
    w1 = w1.at[state_dim, H:HP].set(p["skip_fc2_w"][:, 0])
    b1 = jnp.zeros((1, HPAD), jnp.float32)
    b1 = b1.at[0, :H].set(p["fc1_b"])
    b1 = b1.at[0, H:HP].set(p["skip_fc2_b"])

    w2 = jnp.zeros((HPAD, HPAD), jnp.float32)
    w2 = w2.at[:H, :H].set(p["fc2_w"].T)
    w2 = w2.at[H:HP, H:HP].set(jnp.eye(10, dtype=jnp.float32))
    b2 = jnp.zeros((1, HPAD), jnp.float32)
    b2 = b2.at[0, :H].set(p["fc2_b"])

    w3 = jnp.zeros((HPAD, skip_dim), jnp.float32)
    w3 = w3.at[:HP, :].set(p["skip_fc3_w"].T)
    b3 = jnp.asarray(p["skip_fc3_b"], jnp.float32).reshape(1, skip_dim)

    return dict(
        w1=w1.astype(compute_dtype), b1=b1,
        w2=w2.astype(compute_dtype), b2=b2,
        w3=w3.astype(compute_dtype), b3=b3,
    )


def _choose_tile(B, tile_b):
    tile_b = max(8, (tile_b // 8) * 8)
    if B <= 1024:
        return B if B <= tile_b else tile_b
    # B > 1024: ensure the "parallel" grid has >= 2 steps so v7x's two
    # TensorCores both get work (a ~0.35 us no-op on v5e/v6e), capped at tile_b.
    return min(tile_b, _round_up(pl.cdiv(B, 2), 8))


def _tq_forward_xla(xa, prep):
    """Pure-XLA fallback for tiny batches (same math as the kernel)."""
    dt = prep["w1"].dtype
    h1 = jnp.maximum(
        jnp.dot(xa.astype(dt), prep["w1"], preferred_element_type=jnp.float32)
        + prep["b1"], 0.0)
    cat = jnp.maximum(
        jnp.dot(h1.astype(dt), prep["w2"], preferred_element_type=jnp.float32)
        + prep["b2"], 0.0)
    return jnp.dot(cat.astype(dt), prep["w3"],
                   preferred_element_type=jnp.float32) + prep["b3"]


def tq_forward(x, a, prep, *, tile_b=2048, min_pallas_batch=512):
    """TQ forward.  x: (B, state_dim), a: (B,) or (B, 1), prep: prepare_params()."""
    B, state_dim = x.shape
    skip_dim = prep["w3"].shape[1]

    # Pack the action into the state stream: one input DMA instead of a
    # degenerate (B, 1) block.
    xa = jnp.concatenate(
        [x.astype(jnp.float32), a.reshape(B, 1).astype(jnp.float32)], axis=-1)

    if B < min_pallas_batch:
        # At tiny B the pallas_call is pure fixed overhead; let XLA fuse it.
        return _tq_forward_xla(xa, prep)

    tb = _choose_tile(B, tile_b)
    grid = (pl.cdiv(B, tb),)

    def resident(shape):
        # Full-array block + constant index map -> fetched once, VMEM-resident.
        return pl.BlockSpec(shape, lambda i: (0, 0))

    return pl.pallas_call(
        tq_kernel,
        out_shape=jax.ShapeDtypeStruct((B, skip_dim), jnp.float32),
        grid=grid,
        in_specs=[
            pl.BlockSpec((tb, state_dim + 1), lambda i: (i, 0)),  # packed [x, a]
            resident(prep["w1"].shape), resident(prep["b1"].shape),
            resident(prep["w2"].shape), resident(prep["b2"].shape),
            resident(prep["w3"].shape), resident(prep["b3"].shape),
        ],
        out_specs=pl.BlockSpec((tb, skip_dim), lambda i: (i, 0)),
        compiler_params=pltpu.CompilerParams(
            dimension_semantics=("parallel",),        # batch shards across TCs
            vmem_limit_bytes=32 * 1024 * 1024,        # headroom for tb=2048 on v5e
        ),
    )(xa, prep["w1"], prep["b1"], prep["w2"], prep["b2"], prep["w3"], prep["b3"])


def init_params(key, state_dim, skip_dim, hidden_dim=50):
    """Deterministic synthetic init matching TQ.__init__ shapes (PyTorch (out,in))."""
    ks = jax.random.split(key, 8)

    def lin(kw, kb, out_f, in_f):
        bound = 1.0 / jnp.sqrt(in_f)
        w = jax.random.uniform(kw, (out_f, in_f), jnp.float32, -bound, bound)
        b = jax.random.uniform(kb, (out_f,), jnp.float32, -bound, bound)
        return w, b

    fc1_w, fc1_b = lin(ks[0], ks[1], hidden_dim, state_dim)
    skip_fc2_w, skip_fc2_b = lin(ks[2], ks[3], 10, 1)
    fc2_w, fc2_b = lin(ks[4], ks[5], hidden_dim, hidden_dim)
    skip_fc3_w, skip_fc3_b = lin(ks[6], ks[7], skip_dim, hidden_dim + 10)
    return dict(fc1_w=fc1_w, fc1_b=fc1_b,
                skip_fc2_w=skip_fc2_w, skip_fc2_b=skip_fc2_b,
                fc2_w=fc2_w, fc2_b=fc2_b,
                skip_fc3_w=skip_fc3_w, skip_fc3_b=skip_fc3_b)


def tq_reference(x, a, p):
    """Pure-JAX reference mirroring the PyTorch forward."""
    h = jnp.maximum(x @ p["fc1_w"].T + p["fc1_b"], 0.0)
    h = jnp.maximum(h @ p["fc2_w"].T + p["fc2_b"], 0.0)
    ha = jnp.maximum(a @ p["skip_fc2_w"].T + p["skip_fc2_b"], 0.0)
    cat = jnp.concatenate([h, ha], axis=-1)
    return cat @ p["skip_fc3_w"].T + p["skip_fc3_b"]


if __name__ == "__main__":
    # Full-f32 matmuls for the pure-JAX reference (and the f32 kernel check).
    jax.config.update("jax_default_matmul_precision", "highest")

    key = jax.random.PRNGKey(0)
    k_x, k_a, k_p, k_x2, k_a2 = jax.random.split(key, 5)

    state_dim, skip_dim, hidden_dim = 16, 8, 32
    params = init_params(k_p, state_dim, skip_dim, hidden_dim)

    # ---- small shape, f32 weights, single block (tight tolerance) ----
    b_small = 8
    x_s = jax.random.normal(k_x, (b_small, state_dim), jnp.float32)
    a_s = jax.random.normal(k_a, (b_small, 1), jnp.float32)
    prep_f32 = prepare_params(params, compute_dtype=jnp.float32)
    fwd_small = jax.jit(functools.partial(tq_forward, min_pallas_batch=0))
    out_s = jax.block_until_ready(fwd_small(x_s, a_s, prep_f32))
    ref_s = tq_reference(x_s, a_s, params)
    assert out_s.shape == (b_small, skip_dim)
    assert jnp.allclose(out_s, ref_s, atol=1e-4, rtol=1e-4), "f32 mismatch vs reference"

    # ---- bf16 MXU path, >1024 batch -> 2 parallel steps, partial last block ----
    b_big = 1250
    x_b = jax.random.normal(k_x2, (b_big, state_dim), jnp.float32)
    a_b = jax.random.normal(k_a2, (b_big, 1), jnp.float32)
    prep_bf16 = prepare_params(params)            # bf16 weights (default)
    fwd = jax.jit(tq_forward)
    out_b = jax.block_until_ready(fwd(x_b, a_b, prep_bf16))
    ref_b = tq_reference(x_b, a_b, params)
    assert out_b.shape == (b_big, skip_dim)
    assert jnp.allclose(out_b, ref_b, atol=3e-2, rtol=3e-2), "bf16 mismatch vs reference"

    print("KERNEL_OK")
</pallas_src>

<mosaic_0001>
module attributes {stable_mosaic.version = 11 : i64} {
  func.func @tq_kernel(%arg0: i32, %arg1: memref<8x17xf32, #tpu.memory_space<vmem>>, %arg2: memref<17x128xf32, #tpu.memory_space<vmem>>, %arg3: memref<1x128xf32, #tpu.memory_space<vmem>>, %arg4: memref<128x128xf32, #tpu.memory_space<vmem>>, %arg5: memref<1x128xf32, #tpu.memory_space<vmem>>, %arg6: memref<128x8xf32, #tpu.memory_space<vmem>>, %arg7: memref<1x8xf32, #tpu.memory_space<vmem>>, %arg8: memref<8x8xf32, #tpu.memory_space<vmem>>) attributes {dimension_semantics = [#tpu.dimension_semantics<parallel>], iteration_bounds = array<i64: 1>, scalar_prefetch = 0 : i64, scratch_operands = 0 : i64, tpu.core_type = #tpu.core_type<tc>, window_params = [{transform_indices = @transform_0, window_bounds = array<i64: 8, 17>}, {pipeline_mode = #tpu.pipeline_mode<synchronous>, transform_indices = @transform_1, window_bounds = array<i64: 17, 128>}, {pipeline_mode = #tpu.pipeline_mode<synchronous>, transform_indices = @transform_2, window_bounds = array<i64: 1, 128>}, {pipeline_mode = #tpu.pipeline_mode<synchronous>, transform_indices = @transform_3, window_bounds = array<i64: 128, 128>}, {pipeline_mode = #tpu.pipeline_mode<synchronous>, transform_indices = @transform_4, window_bounds = array<i64: 1, 128>}, {pipeline_mode = #tpu.pipeline_mode<synchronous>, transform_indices = @transform_5, window_bounds = array<i64: 128, 8>}, {pipeline_mode = #tpu.pipeline_mode<synchronous>, transform_indices = @transform_6, window_bounds = array<i64: 1, 8>}, {transform_indices = @transform_7, window_bounds = array<i64: 8, 8>}]} {
    %c0 = arith.constant 0 : index
    %c0_0 = arith.constant 0 : index
    %0 = vector.load %arg1[%c0, %c0_0] : memref<8x17xf32, #tpu.memory_space<vmem>>, vector<8x17xf32>
    %c0_1 = arith.constant 0 : index
    %c0_2 = arith.constant 0 : index
    %1 = vector.load %arg2[%c0_1, %c0_2] : memref<17x128xf32, #tpu.memory_space<vmem>>, vector<17x128xf32>
    %cst = arith.constant dense<0.000000e+00> : vector<8x128xf32>
    %2 = tpu.matmul %0, %1, %cst {dimension_numbers = #tpu.dot_dimension_numbers<[1], [0], [0], [1], [0, 0, 1, 1], [], []>, precision = #tpu.contract_precision<fp32>} : vector<8x17xf32>, vector<17x128xf32>, vector<8x128xf32> -> vector<8x128xf32>
    %c0_3 = arith.constant 0 : index
    %c0_4 = arith.constant 0 : index
    %3 = vector.load %arg3[%c0_3, %c0_4] : memref<1x128xf32, #tpu.memory_space<vmem>>, vector<1x128xf32>
    %4 = vector.broadcast %3 : vector<1x128xf32> to vector<8x128xf32>
    %5 = arith.addf %2, %4 : vector<8x128xf32>
    %cst_5 = arith.constant 0.000000e+00 : f32
    %6 = vector.broadcast %cst_5 : f32 to vector<8x128xf32>
    %7 = arith.maximumf %5, %6 : vector<8x128xf32>
    %c0_6 = arith.constant 0 : index
    %c0_7 = arith.constant 0 : index
    %8 = vector.load %arg4[%c0_6, %c0_7] : memref<128x128xf32, #tpu.memory_space<vmem>>, vector<128x128xf32>
    %cst_8 = arith.constant dense<0.000000e+00> : vector<8x128xf32>
    %9 = tpu.matmul %7, %8, %cst_8 {dimension_numbers = #tpu.dot_dimension_numbers<[1], [0], [0], [1], [0, 0, 1, 1], [], []>, precision = #tpu.contract_precision<fp32>} : vector<8x128xf32>, vector<128x128xf32>, vector<8x128xf32> -> vector<8x128xf32>
    %c0_9 = arith.constant 0 : index
    %c0_10 = arith.constant 0 : index
    %10 = vector.load %arg5[%c0_9, %c0_10] : memref<1x128xf32, #tpu.memory_space<vmem>>, vector<1x128xf32>
    %11 = vector.broadcast %10 : vector<1x128xf32> to vector<8x128xf32>
    %12 = arith.addf %9, %11 : vector<8x128xf32>
    %cst_11 = arith.constant 0.000000e+00 : f32
    %13 = vector.broadcast %cst_11 : f32 to vector<8x128xf32>
    %14 = arith.maximumf %12, %13 : vector<8x128xf32>
    %c0_12 = arith.constant 0 : index
    %c0_13 = arith.constant 0 : index
    %15 = vector.load %arg6[%c0_12, %c0_13] : memref<128x8xf32, #tpu.memory_space<vmem>>, vector<128x8xf32>
    %cst_14 = arith.constant dense<0.000000e+00> : vector<8x8xf32>
    %16 = tpu.matmul %14, %15, %cst_14 {dimension_numbers = #tpu.dot_dimension_numbers<[1], [0], [0], [1], [0, 0, 1, 1], [], []>, precision = #tpu.contract_precision<fp32>} : vector<8x128xf32>, vector<128x8xf32>, vector<8x8xf32> -> vector<8x8xf32>
    %c0_15 = arith.constant 0 : index
    %c0_16 = arith.constant 0 : index
    %17 = vector.load %arg7[%c0_15, %c0_16] : memref<1x8xf32, #tpu.memory_space<vmem>>, vector<1x8xf32>
    %18 = vector.broadcast %17 : vector<1x8xf32> to vector<8x8xf32>
    %19 = arith.addf %16, %18 : vector<8x8xf32>
    %c0_17 = arith.constant 0 : index
    %c0_18 = arith.constant 0 : index
    %20 = vector.load %arg8[%c0_17, %c0_18] : memref<8x8xf32, #tpu.memory_space<vmem>>, vector<8x8xf32>
    tpu.vector_store %arg8[%c0_17, %c0_18], %19 {strides = array<i32>} : memref<8x8xf32, #tpu.memory_space<vmem>>, vector<8x8xf32>,
    return
  }
  func.func @transform_0(%arg0: i32) -> (i32, i32) {
    %c0_i32 = arith.constant 0 : i32
    %c0_i32_0 = arith.constant 0 : i32
    return %arg0, %c0_i32 : i32, i32
  }
  func.func @transform_1(%arg0: i32) -> (i32, i32) {
    %c0_i32 = arith.constant 0 : i32
    %c0_i32_0 = arith.constant 0 : i32
    %c0_i32_1 = arith.constant 0 : i32
    return %c0_i32, %c0_i32_0 : i32, i32
  }
  func.func @transform_2(%arg0: i32) -> (i32, i32) {
    %c0_i32 = arith.constant 0 : i32
    %c0_i32_0 = arith.constant 0 : i32
    %c0_i32_1 = arith.constant 0 : i32
    return %c0_i32, %c0_i32_0 : i32, i32
  }
  func.func @transform_3(%arg0: i32) -> (i32, i32) {
    %c0_i32 = arith.constant 0 : i32
    %c0_i32_0 = arith.constant 0 : i32
    %c0_i32_1 = arith.constant 0 : i32
    return %c0_i32, %c0_i32_0 : i32, i32
  }
  func.func @transform_4(%arg0: i32) -> (i32, i32) {
    %c0_i32 = arith.constant 0 : i32
    %c0_i32_0 = arith.constant 0 : i32
    %c0_i32_1 = arith.constant 0 : i32
    return %c0_i32, %c0_i32_0 : i32, i32
  }
  func.func @transform_5(%arg0: i32) -> (i32, i32) {
    %c0_i32 = arith.constant 0 : i32
    %c0_i32_0 = arith.constant 0 : i32
    %c0_i32_1 = arith.constant 0 : i32
    return %c0_i32, %c0_i32_0 : i32, i32
  }
  func.func @transform_6(%arg0: i32) -> (i32, i32) {
    %c0_i32 = arith.constant 0 : i32
    %c0_i32_0 = arith.constant 0 : i32
    %c0_i32_1 = arith.constant 0 : i32
    return %c0_i32, %c0_i32_0 : i32, i32
  }
  func.func @transform_7(%arg0: i32) -> (i32, i32) {
    %c0_i32 = arith.constant 0 : i32
    %c0_i32_0 = arith.constant 0 : i32
    return %arg0, %c0_i32 : i32, i32
  }
}

</mosaic_0001>

<bundles_post_ra>
// kernel: tq_forward.1
= control target key start
LH: loop header
LB: loop body
LE: loop exit
PB: predicated region body
PF: predicated region fallthrough
CT: control target
= control target key end

     0   :  { %v2935_v3 = vmov 0.0|0.0   ;;  %vm42_vm0 = vcmask 1040384   ;;  %vm2936_vm1 = vmmov 0   ;;  %v2937_v9 = vmov 0.0   ;;  %s3729_s0 = inlined_call_operand.vmem [shape: f32[8,17], index: 0, kind: input, shape index: {}]   ;;  %s3730_s1 = inlined_call_operand.vmem [shape: f32[17,128], index: 1, kind: input, shape index: {}]   ;;  %s3731_s2 = inlined_call_operand.vmem [shape: f32[1,128], index: 2, kind: input, shape index: {}]   ;;  %s3732_s3 = inlined_call_operand.vmem [shape: f32[128,128], index: 3, kind: input, shape index: {}]   ;;  %s3733_s4 = inlined_call_operand.vmem [shape: f32[1,128], index: 4, kind: input, shape index: {}]   ;;  %s3734_s5 = inlined_call_operand.vmem [shape: f32[128,8], index: 5, kind: input, shape index: {}]   ;;  %s3735_s6 = inlined_call_operand.vmem [shape: f32[1,8], index: 6, kind: input, shape index: {}]   ;;  %s3736_s7 = inlined_call_operand.hbm [shape: f32[8,8], index: 7, kind: output, shape index: {}]  }
   0x1   :  { %v28_v0 = vld [vmem:[%s3730_s1] sm:$0xff]  ;;  %v29_v1 = vld [vmem:[%s3730_s1 + $0x8] sm:$0xff]  ;;  %v30_v2 = vld [vmem:[%s3730_s1 + $0x10] sm:$0x1]  ;;  %2578 = vmatprep.subr.bf16.mxu0 %v2935_v3  ;;  %2569 = vmatprep.subr.bf16.mxu1 %v2935_v3  ;;  %vm38_vm2 = vcmask 138240  }
   0x2   :  { %v47_v4 = vand.u32 4294901760, %v28_v0  ;;  %v50_v5 = vand.u32 4294901760, %v29_v1  ;;  %v27_v6 = vld [vmem:[%s3729_s0] sm:$0xff]  ;;  %v44_v8 = vsel %vm42_vm0, %v30_v2, 0  ;;  %2128 = vmatprep.mubr.msk.f32.mxu0 %vm2936_vm1, %v2937_v9  ;;  %2101 = vmatprep.mubr.msk.f32.mxu1 %vm2936_vm1, %v2937_v9  ;;  %v3005_v10 = vld [vmem:[%s3732_s3 + $0x8] sm:$0xff]  ;;  %v3019_v16 = vld [vmem:[%s3732_s3 + $0x10] sm:$0xff] }
   0x3   :  { %v2996_v7 = vld [vmem:[%s3732_s3] sm:$0xff]  ;;  %v3014_v15 = vand.u32 4294901760, %v44_v8  ;;  %v3024_v17 = vld [vmem:[%s3732_s3 + $0x18] sm:$0xff]  ;;  %v40_v18 = vsel %vm38_vm2, %v27_v6, 0  ;;  %v546_v19 = vand.u32 4294901760, %v3005_v10 }
   0x4   :  { %v543_v11 = vand.u32 4294901760, %v2996_v7  ;;  %v3008_v12 = vpack.c.bf16 %v50_v5, %v47_v4  ;;  %v3010_v13 = vsub.f32 %v28_v0, %v47_v4  ;;  %v3012_v14 = vsub.f32 %v29_v1, %v50_v5 }
   0x6   :  { %v3030_v20 = vsub.f32 %v2996_v7, %v543_v11 }
   0x7   :  { %12 = vsyncpa [#allocation3], 0  ;;  %2580 = vmatpush3.bf16.msra.mxu0 %v3008_v12  ;;  %2571 = vmatpush3.bf16.msra.mxu1 %v3008_v12  ;;  %v3035_v21 = vsub.f32 %v44_v8, %v3014_v15  ;;  %v114_v22 = vand.u32 4294901760, %v40_v18  ;;  %v127_v23 = vand.u32 4294901760, %v3010_v13  ;;  %v134_v24 = vand.u32 4294901760, %v3012_v14  ;;  %v3051_v28 = vld [vmem:[%s3732_s3 + $0x20] sm:$0xff] }
   0x8   :  { %2126 = vmatprep.subr.mxu0 %v2937_v9  ;;  %2099 = vmatprep.subr.mxu1 %v2937_v9  ;;  %v3044_v25 = vsub.f32 %v3005_v10, %v546_v19  ;;  %v549_v26 = vand.u32 4294901760, %v3019_v16  ;;  %v552_v27 = vand.u32 4294901760, %v3024_v17  ;;  %v524_v32 = vld [vmem:[%s3732_s3 + $0x28] sm:$0xff]  ;;  %v525_v37 = vld [vmem:[%s3732_s3 + $0x30] sm:$0xff]  ;;  %v526_v38 = vld [vmem:[%s3732_s3 + $0x38] sm:$0xff]  ;;  %v555_v42 = vand.u32 4294901760, %v3051_v28 }
   0x9   :  { %v115_v29 = vsub.f32 %v40_v18, %v114_v22  ;;  %v128_v30 = vsub.f32 %v3010_v13, %v127_v23  ;;  %v135_v31 = vsub.f32 %v3012_v14, %v134_v24  ;;  %v2582_v33 = vpack.c.bf16 %v134_v24, %v127_v23  ;;  %v527_v60 = vld [vmem:[%s3732_s3 + $0x40] sm:$0xff]  ;;  %v528_v61 = vld [vmem:[%s3732_s3 + $0x48] sm:$0xff]  ;;  %v529_v1 = vld [vmem:[%s3732_s3 + $0x50] sm:$0xff]  ;;  %s2938_s21 = smov [#allocation2]  }
   0xa   :  { %v141_v34 = vand.u32 4294901760, %v3035_v21  ;;  %v3062_v35 = vsub.f32 %v3019_v16, %v549_v26  ;;  %v3065_v36 = vsub.f32 %v3024_v17, %v552_v27  ;;  %v558_v43 = vand.u32 4294901760, %v524_v32  ;;  %v530_v2 = vld [vmem:[%s3732_s3 + $0x58] sm:$0xff]  ;;  %v531_v7 = vld [vmem:[%s3732_s3 + $0x60] sm:$0xff]  ;;  %v532_v8 = vld [vmem:[%s3732_s3 + $0x68] sm:$0xff]  ;;  %s1856_s22 = sshll.u32 %s2938_s21, 4  ;;  %s1857_s22 = int_to_ptr.vmem [resolvable:$true] %s1856_s22 }
   0xb   :  { %2127 = vmatpush3.msra.mxu0 %v3014_v15  ;;  %v116_v39 = vand.u32 4294901760, %v115_v29  ;;  %2100 = vmatpush3.msra.mxu1 %v3014_v15  ;;  %v129_v40 = vand.u32 4294901760, %v128_v30  ;;  %v136_v41 = vand.u32 4294901760, %v135_v31  ;;  %v3079_v45 = vsub.f32 %v3051_v28, %v555_v42  ;;  %s2911_s23 = scalar_lea.vmem %s1857_s22, 128  ;;  %p2916_p1 = scmp.lt.s32.totalorder %s1857_s22, %s1857_s22 }
   0xc   :  { %2572 = vmatprep.subr.bf16.mxu1 %v2935_v3  ;;  %2581 = vmatprep.subr.bf16.mxu0 %v2935_v3  ;;  %v561_v46 = vand.u32 4294901760, %v525_v37  ;;  %v564_v47 = vand.u32 4294901760, %v526_v38  ;;  %v142_v49 = vsub.f32 %v3035_v21, %v141_v34  ;;  %v3084_v50 = vsub.f32 %v524_v32, %v558_v43  ;;  %p2912_p0 = scmp.ne.s32.totalorder %s1857_s22, %s2911_s23  ;;  %p2917_p2 = scmp.lt.s32.totalorder %s2911_s23, %s2911_s23 }
   0xd   :  { %2129 = vmatmul.mubr.f32.vlgmr.msra.gmra.mrb[0].mxu0 %v116_v39  ;;  %v117_v44 = vsub.f32 %v115_v29, %v116_v39  ;;  %v2573_v48 = vpack.c.bf16 %v136_v41, %v129_v40  ;;  %v2576_v55 = vpack.c.bf16 %v3012_v14, %v3010_v13  ;;  %v3112_v56 = vpack.c.bf16 %v546_v19, %v543_v11  ;;  %v533_v13 = vld [vmem:[%s3732_s3 + $0x70] sm:$0xff]  ;;  %v534_v14 = vld [vmem:[%s3732_s3 + $0x78] sm:$0xff] }
   0xe   :  { %2583 = vmatpush3.bf16.msra.mxu0 %v2582_v33  ;;  %2137 = vmatprep.mubr.msk.f32.mxu0 %vm2936_vm1, %v2937_v9  ;;  %v3087_v52 = vsub.f32 %v525_v37, %v561_v46  ;;  %v3089_v53 = vsub.f32 %v526_v38, %v564_v47  ;;  %v143_v54 = vand.u32 4294901760, %v142_v49  ;;  %v3120_v57 = vpack.c.bf16 %v552_v27, %v549_v26  ;;  %p2918_p3 = por %p2917_p2, %p2916_p1 }
   0xf   :  { %v118_v51 = vand.u32 4294901760, %v117_v44  ;;  %2135 = vmatprep.subr.mxu0 %v2937_v9  ;;  %v3126_v58 = vpack.c.bf16 %v558_v43, %v555_v42  ;;  %v3130_v59 = vpack.c.bf16 %v564_v47, %v561_v46  ;;  %v567_v62 = vand.u32 4294901760, %v527_v60 }
  0x10   :  { %v570_v63 = vand.u32 4294901760, %v528_v61  ;;  %v573_v4 = vand.u32 4294901760, %v529_v1  ;;  %v576_v5 = vand.u32 4294901760, %v530_v2  ;;  %v579_v10 = vand.u32 4294901760, %v531_v7  ;;  %p2919_p4 = pnand %p2918_p3, %p2912_p0 }
  0x11   :  { %2102 = vmatmul.mubr.f32.vlgmr.msra.gmra.mrb[0].mxu1 %v118_v51  ;;  %v582_v11 = vand.u32 4294901760, %v532_v8  ;;  %v588_v16 = vand.u32 4294901760, %v534_v14  ;;  %v636_v17 = vand.u32 4294901760, %v3030_v20  ;;  %v643_v18 = vand.u32 4294901760, %v3044_v25 }
  0x12   :  { %2574 = vmatpush3.bf16.msra.mxu1 %v2573_v48  ;;  %2136 = vmatpush3.msra.mxu0 %v141_v34  ;;  %v3141_v0 = vpack.c.bf16 %v570_v63, %v567_v62  ;;  %v3151_v6 = vpack.c.bf16 %v576_v5, %v573_v4  ;;  %v3173_v19 = vsub.f32 %v527_v60, %v567_v62  ;;  %v650_v32 = vand.u32 4294901760, %v3062_v35 }
  0x13   :  { %2108 = vmatprep.subr.mxu1 %v2937_v9  ;;  %2110 = vmatprep.mubr.msk.f32.mxu1 %vm2936_vm1, %v2937_v9  ;;  %v3179_v23 = vsub.f32 %v530_v2, %v576_v5  ;;  %v3181_v24 = vsub.f32 %v531_v7, %v579_v10  ;;  %v3183_v26 = vsub.f32 %v532_v8, %v582_v11  ;;  %v657_v33 = vand.u32 4294901760, %v3065_v36 }
  0x14   :  { %2584 = vmatprep.subr.bf16.mxu0 %v2935_v3  ;;  %v637_v30 = vsub.f32 %v3030_v20, %v636_v17  ;;  %v644_v31 = vsub.f32 %v3044_v25, %v643_v18  ;;  %v651_v38 = vsub.f32 %v3062_v35, %v650_v32  ;;  %v664_v43 = vand.u32 4294901760, %v3079_v45 }
  0x15   :  { %2138 = vmatmul.mubr.f32.vlgmr.msra.gmra.mrb[0].mxu0 %v114_v22  ;;  %v658_v39 = vsub.f32 %v3065_v36, %v657_v33  ;;  %v3747_v44 = vand.u32 4294901760, %v3084_v50  ;;  %v3744_v2 = vand.u32 4294901760, %v3173_v19  ;;  %vm1848_vm3 = vcmask 64512  }
  0x16   :  { %2109 = vmatpush3.msra.mxu1 %v143_v54  ;;  %2586 = vmatpush3.bf16.msra.mxu0 %v3008_v12  ;;  %v3161_v12 = vpack.c.bf16 %v582_v11, %v579_v10  ;;  %v638_v34 = vand.u32 4294901760, %v637_v30  ;;  %v645_v37 = vand.u32 4294901760, %v644_v31  ;;  %v652_v41 = vand.u32 4294901760, %v651_v38 }
  0x17   :  { %2575 = vmatprep.subr.bf16.mxu1 %v2935_v3  ;;  %2144 = vmatprep.subr.mxu0 %v2937_v9  ;;  %v659_v42 = vand.u32 4294901760, %v658_v39  ;;  %v665_v47 = vsub.f32 %v3079_v45, %v664_v43  ;;  %v672_v48 = vsub.f32 %v3084_v50, %v3747_v44  ;;  %v3746_v54 = vand.u32 4294901760, %v3087_v52 }
  0x18   :  { %2146 = vmatprep.mubr.msk.f32.mxu0 %vm2936_vm1, %v2937_v9  ;;  %v3207_v40 = vpack.c.bf16 %v645_v37, %v638_v34  ;;  %v693_v7 = vsub.f32 %v3173_v19, %v3744_v2  ;;  %v3740_v37 = vand.u32 4294901760, %v3181_v24  ;;  %v3739_v38 = vand.u32 4294901760, %v3183_v26  ;;  %v1193_v2 = vld [vmem:[%s3734_s5 + $0x48] sm:$0xff] }
  0x19   :  { %2111 = vmatmul.mubr.f32.vlgmr.msra.gmra.mrb[0].mxu1 %v114_v22  ;;  %v3211_v46 = vpack.c.bf16 %v659_v42, %v652_v41  ;;  %v666_v49 = vand.u32 4294901760, %v665_v47  ;;  %v673_v51 = vand.u32 4294901760, %v672_v48 }
  0x1a   :  { %2577 = vmatpush3.bf16.msra.mxu1 %v2576_v55  ;;  %2145 = vmatpush3.msra.mxu0 %v3014_v15  ;;  %v585_v15 = vand.u32 4294901760, %v533_v13  ;;  %v3745_v55 = vand.u32 4294901760, %v3089_v53  ;;  %v694_v10 = vand.u32 4294901760, %v693_v7  ;;  %v721_v41 = vsub.f32 %v3181_v24, %v3740_v37 }
  0x1b   :  { %2117 = vmatprep.subr.mxu1 %v2937_v9  ;;  %2119 = vmatprep.mubr.msk.f32.mxu1 %vm2936_vm1, %v2937_v9  ;;  %v2618_v60 = vpack.c.bf16 %v673_v51, %v666_v49  ;;  %v728_v42 = vsub.f32 %v3183_v26, %v3739_v38 }
  0x1c   :  { %2731 = vmatprep.subr.bf16.mxu0 %v2935_v3  ;;  %v3185_v27 = vpack.c.bf16 %v588_v16, %v585_v15  ;;  %v3187_v28 = vsub.f32 %v533_v13, %v585_v15  ;;  %v686_v62 = vsub.f32 %v3089_v53, %v3745_v55  ;;  %v722_v47 = vand.u32 4294901760, %v721_v41 }
  0x1d   :  { %2147 = vmatmul.mubr.f32.vlgmr.msra.gmra.mrb[0].mxu0 %v114_v22  ;;  %v3177_v22 = vsub.f32 %v529_v1, %v573_v4  ;;  %v729_v48 = vand.u32 4294901760, %v728_v42  ;;  %v2654_v41 = vpack.c.bf16 %v3183_v26, %v3181_v24 }
  0x1e   :  { %2118 = vmatpush3.msra.mxu1 %v3035_v21  ;;  %2391 = vmatprep.mubr.msk.f32.mxu0 %vm2936_vm1, %v2937_v9  ;;  %v3175_v21 = vsub.f32 %v528_v61, %v570_v63  ;;  %v679_v61 = vsub.f32 %v3087_v52, %v3746_v54  ;;  %v687_v1 = vand.u32 4294901760, %v686_v62  ;;  %v3738_v49 = vand.u32 4294901760, %v3187_v28 }
  0x1f   :  { %2587 = vmatprep.subr.bf16.mxu1 %v2935_v3  ;;  %v3742_v13 = vand.u32 4294901760, %v3177_v22 }
  0x20   :  { %v680_v63 = vand.u32 4294901760, %v679_v61  ;;  %v3743_v4 = vand.u32 4294901760, %v3175_v21  ;;  %v2630_v61 = vpack.c.bf16 %v729_v48, %v722_v47  ;;  %v735_v62 = vsub.f32 %v3187_v28, %v3738_v49 }
  0x21   :  { %2120 = vmatmul.mubr.f32.vlgmr.msra.gmra.mrb[0].mxu1 %v115_v29  ;;  %v3189_v29 = vsub.f32 %v534_v14, %v588_v16  ;;  %v3741_v14 = vand.u32 4294901760, %v3179_v23  ;;  %v707_v16 = vsub.f32 %v3177_v22, %v3742_v13 }
  0x22   :  { %2589 = vmatpush3.bf16.msra.mxu1 %v3112_v56  ;;  %2181 = vmatprep.mubr.msk.f32.mxu1 %vm2936_vm1, %v2937_v9  ;;  %v2621_v5 = vpack.c.bf16 %v687_v1, %v680_v63  ;;  %v700_v8 = vsub.f32 %v3175_v21, %v3743_v4  ;;  %v736_v1 = vand.u32 4294901760, %v735_v62  ;;  %v1864_v62 = vld [vmem:[%s3731_s2] ss:$0 sm:$0xff] }
  0x23   :  { %2590 = vmatprep.subr.bf16.mxu1 %v2935_v3  ;;  %v714_v30 = vsub.f32 %v3179_v23, %v3741_v14  ;;  %v708_v31 = vand.u32 4294901760, %v707_v16  ;;  %v3737_v51 = vand.u32 4294901760, %v3189_v29  ;;  %v2642_v16 = vpack.c.bf16 %v3084_v50, %v3079_v45 }
  0x24   :  { %v701_v11 = vand.u32 4294901760, %v700_v8  ;;  %v2657_v42 = vpack.c.bf16 %v3189_v29, %v3187_v28  ;;  %v3757_v45 = vand.u32 4294901760, %v3177_v22 }
  0x25   :  { %v715_v34 = vand.u32 4294901760, %v714_v30  ;;  %v742_v63 = vsub.f32 %v3189_v29, %v3737_v51  ;;  %v2645_v30 = vpack.c.bf16 %v3089_v53, %v3087_v52 }
  0x26   :  { %2592 = vmatpush3.bf16.msra.mxu1 %v3120_v57  ;;  %v2624_v15 = vpack.c.bf16 %v701_v11, %v694_v10  ;;  %v2636_v10 = vpack.c.bf16 %v3044_v25, %v3030_v20  ;;  %v2639_v11 = vpack.c.bf16 %v3065_v36, %v3062_v35  ;;  %v3752_v20 = vand.u32 4294901760, %v3084_v50 }
  0x27   :  { %2593 = vmatprep.subr.bf16.mxu1 %v2935_v3  ;;  %v2627_v39 = vpack.c.bf16 %v715_v34, %v708_v31  ;;  %v743_v7 = vand.u32 4294901760, %v742_v63  ;;  %v2648_v31 = vpack.c.bf16 %v3175_v21, %v3173_v19  ;;  %v2651_v34 = vpack.c.bf16 %v3179_v23, %v3177_v22 }
  0x28   :  { %v2690_v25 = vpack.c.bf16 %v3752_v20, %v664_v43  ;;  %v3754_v35 = vand.u32 4294901760, %v3089_v53  ;;  %v3758_v50 = vand.u32 4294901760, %v3179_v23  ;;  %v3760_v53 = vand.u32 4294901760, %v3183_v26  ;;  %v1198_v26 = vld [vmem:[%s3734_s5 + $0x70] sm:$0xff] }
  0x29   :  { %v2633_v8 = vpack.c.bf16 %v743_v7, %v736_v1 }
  0x2a   :  { %2595 = vmatpush3.bf16.msra.mxu1 %v3126_v58  ;;  %v2699_v43 = vpack.c.bf16 %v3758_v50, %v3757_v45 }
  0x2b   :  { %2596 = vmatprep.subr.bf16.mxu1 %v2935_v3 }
  0x2e   :  { %2598 = vmatpush3.bf16.msra.mxu1 %v3130_v59 }
  0x2f   :  { %2599 = vmatprep.subr.bf16.mxu1 %v2935_v3 }
  0x32   :  { %2601 = vmatpush3.bf16.msra.mxu1 %v3141_v0 }
  0x33   :  { %2602 = vmatprep.subr.bf16.mxu1 %v2935_v3 }
  0x36   :  { %2604 = vmatpush3.bf16.msra.mxu1 %v3151_v6 }
  0x37   :  { %2605 = vmatprep.subr.bf16.mxu1 %v2935_v3 }
  0x3a   :  { %2607 = vmatpush3.bf16.msra.mxu1 %v3161_v12 }
  0x3b   :  { %2608 = vmatprep.subr.bf16.mxu1 %v2935_v3 }
  0x3e   :  { %2610 = vmatpush3.bf16.msra.mxu1 %v3185_v27 }
  0x3f   :  { %2611 = vmatprep.subr.bf16.mxu1 %v2935_v3 }
  0xf0   :  { %v514_v47 = vpop.f32.mrb[0].mxu0 }
  0xf1   :  { %v2148_v48 = vpop.f32.mrb[1].mxu0 }
  0xf4   :  { %v284_v63 = vpop.f32.mrb[0].mxu1 }
  0xf5   :  { %v2875_v1 = vadd.f32 %v1864_v62, %v284_v63  ;;  %v2121_v7 = vpop.f32.mrb[1].mxu1  ;;  %v1191_v62 = vld [vmem:[%s3734_s5 + $0x38] sm:$0xff]  ;;  %v1192_v63 = vld [vmem:[%s3734_s5 + $0x40] sm:$0xff] }
  0xf7   :  { %v2876_v51 = vadd.f32 %v2875_v1, %v514_v47  ;;  %v1190_v47 = vld [vmem:[%s3734_s5 + $0x30] sm:$0xff] }
  0xf9   :  { %v518_v49 = vmax.f32 %v2876_v51, 0.0  ;;  %v1189_v51 = vld [vmem:[%s3734_s5 + $0x28] sm:$0xff] }
  0xfb   :  { %v3278_v38 = vand.u32 4294901760, %v518_v49 }
  0xfd   :  { %v3281_v37 = vsub.f32 %v518_v49, %v3278_v38  ;;  %v1188_v49 = vld [vmem:[%s3734_s5 + $0x20] sm:$0xff] }
  0xff   :  { %v625_v14 = vand.u32 4294901760, %v3281_v37 }
 0x101   :  { %v626_v48 = vsub.f32 %v3281_v37, %v625_v14 }
 0x103   :  { %v627_v13 = vand.u32 4294901760, %v626_v48 }
 0x105   :  { %2182 = vmatmul.mubr.f32.vlgmr.msra.gmra.mrb[2].mxu1 %v627_v13 }
 0x106   :  { %2613 = vmatpush3.bf16.msra.mxu1 %v3207_v40  ;;  %2216 = vmatprep.mubr.msk.f32.mxu1 %vm2936_vm1, %v2937_v9  ;;  %v1184_v40 = vld [vmem:[%s3734_s5] sm:$0xff] }
 0x107   :  { %2614 = vmatprep.subr.bf16.mxu1 %v2935_v3 }
 0x10a   :  { %2616 = vmatpush3.bf16.msra.mxu1 %v3211_v46  ;;  %v1185_v46 = vld [vmem:[%s3734_s5 + $0x8] sm:$0xff] }
 0x10b   :  { %2617 = vmatprep.subr.bf16.mxu1 %v2935_v3  ;;  %v1211_v13 = vand.u32 4294901760, %v1185_v46 }
 0x10d   :  { %v3334_v48 = vsub.f32 %v1185_v46, %v1211_v13  ;;  %v1226_v46 = vand.u32 4294901760, %v1190_v47 }
 0x10e   :  { %2619 = vmatpush3.bf16.msra.mxu1 %v2618_v60  ;;  %v1186_v60 = vld [vmem:[%s3734_s5 + $0x10] sm:$0xff] }
 0x10f   :  { %2620 = vmatprep.subr.bf16.mxu1 %v2935_v3 }
 0x112   :  { %2622 = vmatpush3.bf16.msra.mxu1 %v2621_v5  ;;  %v1208_v5 = vand.u32 4294901760, %v1184_v40 }
 0x113   :  { %2623 = vmatprep.subr.bf16.mxu1 %v2935_v3 }
 0x114   :  { %v3330_v1 = vpack.c.bf16 %v1211_v13, %v1208_v5  ;;  %v3332_v7 = vsub.f32 %v1184_v40, %v1208_v5  ;;  %v1232_v5 = vand.u32 4294901760, %v1192_v63  ;;  %v1235_v13 = vand.u32 4294901760, %v1193_v2 }
 0x116   :  { %2625 = vmatpush3.bf16.msra.mxu1 %v2624_v15  ;;  %v1187_v15 = vld [vmem:[%s3734_s5 + $0x18] sm:$0xff]  ;;  %2733 = vmatpush3.bf16.msra.mxu0 %v3330_v1 }
 0x117   :  { %2626 = vmatprep.subr.bf16.mxu1 %v2935_v3  ;;  %2734 = vmatprep.subr.bf16.mxu0 %v2935_v3 }
 0x11a   :  { %2628 = vmatpush3.bf16.msra.mxu1 %v2627_v39  ;;  %v1214_v39 = vand.u32 4294901760, %v1186_v60 }
 0x11b   :  { %2629 = vmatprep.subr.bf16.mxu1 %v2935_v3 }
 0x11c   :  { %v3336_v4 = vsub.f32 %v1186_v60, %v1214_v39  ;;  %v1229_v60 = vand.u32 4294901760, %v1191_v62 }
 0x11e   :  { %2631 = vmatpush3.bf16.msra.mxu1 %v2630_v61  ;;  %v1217_v61 = vand.u32 4294901760, %v1187_v15 }
 0x11f   :  { %2632 = vmatprep.subr.bf16.mxu1 %v2935_v3 }
 0x120   :  { %v3341_v55 = vpack.c.bf16 %v1217_v61, %v1214_v39  ;;  %v3343_v54 = vsub.f32 %v1187_v15, %v1217_v61  ;;  %v3355_v15 = vsub.f32 %v1190_v47, %v1226_v46  ;;  %v3357_v39 = vsub.f32 %v1191_v62, %v1229_v60 }
 0x121   :  { %v3361_v61 = vsub.f32 %v1193_v2, %v1235_v13  ;;  %v3375_v2 = vpack.c.bf16 %v1229_v60, %v1226_v46 }
 0x122   :  { %2634 = vmatpush3.bf16.msra.mxu1 %v2633_v8  ;;  %v1220_v8 = vand.u32 4294901760, %v1188_v49  ;;  %2736 = vmatpush3.bf16.msra.mxu0 %v3341_v55 }
 0x123   :  { %2635 = vmatprep.subr.bf16.mxu1 %v2935_v3  ;;  %2737 = vmatprep.subr.bf16.mxu0 %v2935_v3 }
 0x124   :  { %v3345_v44 = vsub.f32 %v1188_v49, %v1220_v8  ;;  %v3359_v49 = vsub.f32 %v1192_v63, %v1232_v5 }
 0x125   :  { %2217 = vmatmul.mubr.f32.vlgmr.msra.gmra.mrb[2].mxu1 %v3278_v38 }
 0x126   :  { %2637 = vmatpush3.bf16.msra.mxu1 %v2636_v10  ;;  %2251 = vmatprep.mubr.msk.f32.mxu1 %vm2936_vm1, %v2937_v9  ;;  %v1223_v10 = vand.u32 4294901760, %v1189_v51 }
 0x127   :  { %2638 = vmatprep.subr.bf16.mxu1 %v2935_v3 }
 0x128   :  { %v3351_v40 = vsub.f32 %v1189_v51, %v1223_v10 }
 0x12a   :  { %2640 = vmatpush3.bf16.msra.mxu1 %v2639_v11  ;;  %v3367_v11 = vpack.c.bf16 %v1223_v10, %v1220_v8 }
 0x12b   :  { %2641 = vmatprep.subr.bf16.mxu1 %v2935_v3 }
 0x12c   :  { %2739 = vmatpush3.bf16.msra.mxu0 %v3367_v11 }
 0x12d   :  { %2740 = vmatprep.subr.bf16.mxu0 %v2935_v3 }
 0x12e   :  { %2643 = vmatpush3.bf16.msra.mxu1 %v2642_v16  ;;  %v3383_v16 = vpack.c.bf16 %v1235_v13, %v1232_v5  ;;  %v1315_v13 = vand.u32 4294901760, %v3336_v4 }
 0x12f   :  { %2644 = vmatprep.subr.bf16.mxu1 %v2935_v3 }
 0x130   :  { %2742 = vmatpush3.bf16.msra.mxu0 %v3375_v2  ;;  %v1316_v20 = vsub.f32 %v3336_v4, %v1315_v13 }
 0x131   :  { %2743 = vmatprep.subr.bf16.mxu0 %v2935_v3 }
 0x132   :  { %2646 = vmatpush3.bf16.msra.mxu1 %v2645_v30  ;;  %v2684_v30 = vpack.c.bf16 %v643_v18, %v636_v17  ;;  %v3753_v17 = vand.u32 4294901760, %v3087_v52  ;;  %v3755_v18 = vand.u32 4294901760, %v3173_v19  ;;  %v3759_v52 = vand.u32 4294901760, %v3181_v24 }
 0x133   :  { %2647 = vmatprep.subr.bf16.mxu1 %v2935_v3  ;;  %v3761_v19 = vand.u32 4294901760, %v3187_v28  ;;  %v1250_v28 = vand.u32 4294901760, %v1198_v26 }
 0x134   :  { %2745 = vmatpush3.bf16.msra.mxu0 %v3383_v16  ;;  %v2693_v36 = vpack.c.bf16 %v3754_v35, %v3753_v17  ;;  %v1329_v17 = vand.u32 4294901760, %v3345_v44  ;;  %v1336_v35 = vand.u32 4294901760, %v3351_v40 }
 0x135   :  { %2746 = vmatprep.subr.bf16.mxu0 %v2935_v3  ;;  %v3528_v63 = vsub.f32 %v1198_v26, %v1250_v28 }
 0x136   :  { %2649 = vmatpush3.bf16.msra.mxu1 %v2648_v31  ;;  %v2687_v31 = vpack.c.bf16 %v657_v33, %v650_v32  ;;  %v3756_v32 = vand.u32 4294901760, %v3175_v21  ;;  %v3762_v21 = vand.u32 4294901760, %v3189_v29 }
 0x137   :  { %2650 = vmatprep.subr.bf16.mxu1 %v2935_v3 }
 0x138   :  { %v2696_v33 = vpack.c.bf16 %v3756_v32, %v3755_v18  ;;  %v1330_v32 = vsub.f32 %v3345_v44, %v1329_v17 }
 0x13a   :  { %2652 = vmatpush3.bf16.msra.mxu1 %v2651_v34  ;;  %v1308_v34 = vand.u32 4294901760, %v3334_v48  ;;  %v1331_v50 = vand.u32 4294901760, %v1330_v32 }
 0x13b   :  { %2653 = vmatprep.subr.bf16.mxu1 %v2935_v3 }
 0x13c   :  { %v1309_v51 = vsub.f32 %v3334_v48, %v1308_v34 }
 0x13e   :  { %2655 = vmatpush3.bf16.msra.mxu1 %v2654_v41  ;;  %v1310_v5 = vand.u32 4294901760, %v1309_v51 }
 0x13f   :  { %2656 = vmatprep.subr.bf16.mxu1 %v2935_v3 }
 0x142   :  { %2658 = vmatpush3.bf16.msra.mxu1 %v2657_v42 }
 0x143   :  { %2659 = vmatprep.subr.bf16.mxu1 %v2935_v3 }
 0x145   :  { %2252 = vmatmul.mubr.f32.vlgmr.msra.gmra.mrb[2].mxu1 %v3281_v37  ;;  %v2705_v37 = vpack.c.bf16 %v3762_v21, %v3761_v19 }
 0x146   :  { %2661 = vmatpush3.bf16.msra.mxu1 %v3112_v56  ;;  %2286 = vmatprep.mubr.msk.f32.mxu1 %vm2936_vm1, %v2937_v9 }
 0x147   :  { %2662 = vmatprep.subr.bf16.mxu1 %v2935_v3 }
 0x14a   :  { %2664 = vmatpush3.bf16.msra.mxu1 %v3120_v57 }
 0x14b   :  { %2665 = vmatprep.subr.bf16.mxu1 %v2935_v3 }
 0x14e   :  { %2667 = vmatpush3.bf16.msra.mxu1 %v3126_v58 }
 0x14f   :  { %2668 = vmatprep.subr.bf16.mxu1 %v2935_v3 }
 0x152   :  { %2670 = vmatpush3.bf16.msra.mxu1 %v3130_v59 }
 0x153   :  { %2671 = vmatprep.subr.bf16.mxu1 %v2935_v3 }
 0x156   :  { %2673 = vmatpush3.bf16.msra.mxu1 %v3141_v0 }
 0x157   :  { %2674 = vmatprep.subr.bf16.mxu1 %v2935_v3 }
 0x15a   :  { %2676 = vmatpush3.bf16.msra.mxu1 %v3151_v6 }
 0x15b   :  { %2677 = vmatprep.subr.bf16.mxu1 %v2935_v3 }
 0x15e   :  { %2679 = vmatpush3.bf16.msra.mxu1 %v3161_v12 }
 0x15f   :  { %2680 = vmatprep.subr.bf16.mxu1 %v2935_v3 }
 0x162   :  { %2682 = vmatpush3.bf16.msra.mxu1 %v3185_v27 }
 0x163   :  { %2683 = vmatprep.subr.bf16.mxu1 %v2935_v3 }
 0x165   :  { %2287 = vmatmul.mubr.f32.vlgmr.msra.gmra.mrb[2].mxu1 %v625_v14  ;;  %v2702_v14 = vpack.c.bf16 %v3760_v53, %v3759_v52  ;;  %v1343_v52 = vand.u32 4294901760, %v3355_v15  ;;  %v1350_v53 = vand.u32 4294901760, %v3357_v39 }
 0x166   :  { %2685 = vmatpush3.bf16.msra.mxu1 %v2684_v30  ;;  %2321 = vmatprep.mubr.msk.f32.mxu1 %vm2936_vm1, %v2937_v9  ;;  %v1322_v30 = vand.u32 4294901760, %v3343_v54 }
 0x167   :  { %2686 = vmatprep.subr.bf16.mxu1 %v2935_v3  ;;  %v1344_v19 = vsub.f32 %v3355_v15, %v1343_v52  ;;  %v1351_v21 = vsub.f32 %v3357_v39, %v1350_v53 }
 0x16a   :  { %2688 = vmatpush3.bf16.msra.mxu1 %v2687_v31 }
 0x16b   :  { %2689 = vmatprep.subr.bf16.mxu1 %v2935_v3 }
 0x16e   :  { %2691 = vmatpush3.bf16.msra.mxu1 %v2690_v25  ;;  %v1323_v25 = vsub.f32 %v3343_v54, %v1322_v30 }
 0x16f   :  { %2692 = vmatprep.subr.bf16.mxu1 %v2935_v3 }
 0x170   :  { %v1324_v18 = vand.u32 4294901760, %v1323_v25 }
 0x172   :  { %2694 = vmatpush3.bf16.msra.mxu1 %v2693_v36  ;;  %v1317_v36 = vand.u32 4294901760, %v1316_v20 }
 0x173   :  { %2695 = vmatprep.subr.bf16.mxu1 %v2935_v3 }
 0x174   :  { %v2759_v45 = vpack.c.bf16 %v1324_v18, %v1317_v36 }
 0x176   :  { %2697 = vmatpush3.bf16.msra.mxu1 %v2696_v33  ;;  %v1337_v33 = vsub.f32 %v3351_v40, %v1336_v35 }
 0x177   :  { %2698 = vmatprep.subr.bf16.mxu1 %v2935_v3 }
 0x17a   :  { %2700 = vmatpush3.bf16.msra.mxu1 %v2699_v43  ;;  %v1338_v43 = vand.u32 4294901760, %v1337_v33 }
 0x17b   :  { %2701 = vmatprep.subr.bf16.mxu1 %v2935_v3 }
 0x17e   :  { %2703 = vmatpush3.bf16.msra.mxu1 %v2702_v14  ;;  %v2762_v14 = vpack.c.bf16 %v1338_v43, %v1331_v50  ;;  %v3749_v50 = vand.u32 4294901760, %v3528_v63 }
 0x17f   :  { %2704 = vmatprep.subr.bf16.mxu1 %v2935_v3 }
 0x182   :  { %2706 = vmatpush3.bf16.msra.mxu1 %v2705_v37  ;;  %v1345_v37 = vand.u32 4294901760, %v1344_v19 }
 0x183   :  { %2707 = vmatprep.subr.bf16.mxu1 %v2935_v3 }
 0x185   :  { %2322 = vmatmul.mubr.f32.vlgmr.msra.gmra.mrb[2].mxu1 %v3278_v38 }
 0x186   :  { %2709 = vmatpush3.bf16.msra.mxu1 %v3112_v56  ;;  %2356 = vmatprep.mubr.msk.f32.mxu1 %vm2936_vm1, %v2937_v9  ;;  %v1194_v56 = vld [vmem:[%s3734_s5 + $0x50] sm:$0xff] }
 0x187   :  { %2710 = vmatprep.subr.bf16.mxu1 %v2935_v3 }
 0x18a   :  { %2712 = vmatpush3.bf16.msra.mxu1 %v3120_v57  ;;  %v1195_v57 = vld [vmem:[%s3734_s5 + $0x58] sm:$0xff] }
 0x18b   :  { %2713 = vmatprep.subr.bf16.mxu1 %v2935_v3 }
 0x18e   :  { %2715 = vmatpush3.bf16.msra.mxu1 %v3126_v58  ;;  %v1238_v58 = vand.u32 4294901760, %v1194_v56 }
 0x18f   :  { %2716 = vmatprep.subr.bf16.mxu1 %v2935_v3 }
 0x190   :  { %v3519_v8 = vsub.f32 %v1194_v56, %v1238_v58  ;;  %v1352_v56 = vand.u32 4294901760, %v1351_v21  ;;  %v1400_v21 = vsub.f32 %v3528_v63, %v3749_v50 }
 0x192   :  { %2718 = vmatpush3.bf16.msra.mxu1 %v3130_v59  ;;  %v1241_v59 = vand.u32 4294901760, %v1195_v57  ;;  %v1371_v26 = vand.u32 4294901760, %v3519_v8 }
 0x193   :  { %2719 = vmatprep.subr.bf16.mxu1 %v2935_v3 }
 0x194   :  { %v3521_v10 = vsub.f32 %v1195_v57, %v1241_v59  ;;  %v1357_v57 = vand.u32 4294901760, %v3359_v49 }
 0x196   :  { %2721 = vmatpush3.bf16.msra.mxu1 %v3141_v0  ;;  %v3489_v0 = vpack.c.bf16 %v1241_v59, %v1238_v58  ;;  %v1364_v58 = vand.u32 4294901760, %v3361_v61  ;;  %v2765_v59 = vpack.c.bf16 %v1352_v56, %v1345_v37  ;;  %v1401_v56 = vand.u32 4294901760, %v1400_v21 }
 0x197   :  { %2722 = vmatprep.subr.bf16.mxu1 %v2935_v3 }
 0x198   :  { %2748 = vmatpush3.bf16.msra.mxu0 %v3489_v0 }
 0x199   :  { %2749 = vmatprep.subr.bf16.mxu0 %v2935_v3 }
 0x19a   :  { %2724 = vmatpush3.bf16.msra.mxu1 %v3151_v6  ;;  %v1196_v6 = vld [vmem:[%s3734_s5 + $0x60] sm:$0xff] }
 0x19b   :  { %2725 = vmatprep.subr.bf16.mxu1 %v2935_v3  ;;  %v1244_v22 = vand.u32 4294901760, %v1196_v6 }
 0x19d   :  { %v3523_v47 = vsub.f32 %v1196_v6, %v1244_v22  ;;  %v1358_v6 = vsub.f32 %v3359_v49, %v1357_v57 }
 0x19e   :  { %2727 = vmatpush3.bf16.msra.mxu1 %v3161_v12  ;;  %v1197_v12 = vld [vmem:[%s3734_s5 + $0x68] sm:$0xff] }
 0x19f   :  { %2728 = vmatprep.subr.bf16.mxu1 %v2935_v3  ;;  %v1247_v23 = vand.u32 4294901760, %v1197_v12 }
 0x1a1   :  { %v3499_v24 = vpack.c.bf16 %v1247_v23, %v1244_v22  ;;  %v3525_v62 = vsub.f32 %v1197_v12, %v1247_v23  ;;  %v1365_v12 = vsub.f32 %v3361_v61, %v1364_v58  ;;  %v1359_v22 = vand.u32 4294901760, %v1358_v6 }
 0x1a2   :  { %2730 = vmatpush3.bf16.msra.mxu1 %v3185_v27  ;;  %v1199_v27 = vld [vmem:[%s3734_s5 + $0x78] sm:$0xff] }
 0x1a3   :  { %2751 = vmatpush3.bf16.msra.mxu0 %v3499_v24  ;;  %v1253_v29 = vand.u32 4294901760, %v1199_v27  ;;  %v1366_v23 = vand.u32 4294901760, %v1365_v12  ;;  %v3750_v20 = vand.u32 4294901760, %v3525_v62 }
 0x1a4   :  { %2752 = vmatprep.subr.bf16.mxu0 %v2935_v3 }
 0x1a5   :  { %2357 = vmatmul.mubr.f32.vlgmr.msra.gmra.mrb[2].mxu1 %v3278_v38  ;;  %v1301_v38 = vand.u32 4294901760, %v3332_v7  ;;  %v3511_v41 = vpack.c.bf16 %v1253_v29, %v1250_v28  ;;  %v3530_v46 = vsub.f32 %v1199_v27, %v1253_v29  ;;  %v1378_v27 = vand.u32 4294901760, %v3521_v10 }
 0x1a6   :  { %v2768_v28 = vpack.c.bf16 %v1366_v23, %v1359_v22  ;;  %v1372_v29 = vsub.f32 %v3519_v8, %v1371_v26  ;;  %v1393_v18 = vsub.f32 %v3525_v62, %v3750_v20  ;;  %v2780_v22 = vpack.c.bf16 %v3334_v48, %v3332_v7 }
 0x1a7   :  { %v1302_v42 = vsub.f32 %v3332_v7, %v1301_v38  ;;  %2754 = vmatpush3.bf16.msra.mxu0 %v3511_v41  ;;  %v3748_v43 = vand.u32 4294901760, %v3530_v46  ;;  %v2783_v23 = vpack.c.bf16 %v3343_v54, %v3336_v4  ;;  %v2834_v7 = vpack.c.bf16 %v1336_v35, %v1329_v17 }
 0x1a8   :  { %2755 = vmatprep.subr.bf16.mxu0 %v2935_v3  ;;  %v1373_v51 = vand.u32 4294901760, %v1372_v29  ;;  %v1394_v33 = vand.u32 4294901760, %v1393_v18  ;;  %v2786_v29 = vpack.c.bf16 %v3351_v40, %v3345_v44  ;;  %v2801_v18 = vpack.c.bf16 %v3530_v46, %v3528_v63 }
 0x1a9   :  { %v1303_v60 = vand.u32 4294901760, %v1302_v42  ;;  %v1379_v42 = vsub.f32 %v3521_v10, %v1378_v27  ;;  %v1407_v37 = vsub.f32 %v3530_v46, %v3748_v43  ;;  %v2837_v54 = vpack.c.bf16 %v1350_v53, %v1343_v52 }
 0x1aa   :  { %v2840_v4 = vpack.c.bf16 %v1364_v58, %v1357_v57  ;;  %v2843_v44 = vpack.c.bf16 %v1378_v27, %v1371_v26  ;;  %v3763_v48 = vand.u32 4294901760, %v3523_v47  ;;  %v3764_v40 = vand.u32 4294901760, %v3525_v62 }
 0x1ab   :  { %v3535_v31 = vpack.c.bf16 %v1310_v5, %v1303_v60  ;;  %v1380_v60 = vand.u32 4294901760, %v1379_v42  ;;  %v3751_v5 = vand.u32 4294901760, %v3523_v47  ;;  %v1408_v6 = vand.u32 4294901760, %v1407_v37 }
 0x1ac   :  { %v2789_v42 = vpack.c.bf16 %v3357_v39, %v3355_v15  ;;  %v2846_v15 = vpack.c.bf16 %v3764_v40, %v3763_v48  ;;  %v3765_v39 = vand.u32 4294901760, %v3528_v63 }
 0x1ad   :  { %v2771_v25 = vpack.c.bf16 %v1380_v60, %v1373_v51  ;;  %v1386_v36 = vsub.f32 %v3523_v47, %v3751_v5  ;;  %v2777_v12 = vpack.c.bf16 %v1408_v6, %v1401_v56  ;;  %v2792_v51 = vpack.c.bf16 %v3361_v61, %v3359_v49 }
 0x1ae   :  { %v2795_v60 = vpack.c.bf16 %v3521_v10, %v3519_v8  ;;  %v3766_v49 = vand.u32 4294901760, %v3530_v46 }
 0x1af   :  { %v1387_v32 = vand.u32 4294901760, %v1386_v36  ;;  %v2798_v36 = vpack.c.bf16 %v3525_v62, %v3523_v47 }
 0x1b0   :  { %v2849_v61 = vpack.c.bf16 %v3766_v49, %v3765_v39 }
 0x1b1   :  { %v2774_v19 = vpack.c.bf16 %v1394_v33, %v1387_v32  ;;  %v1865_v32 = vld [vmem:[%s3733_s4] ss:$0 sm:$0xff] }
 0x278   :  { %v1179_v33 = vpop.f32.mrb[2].mxu1 }
 0x279   :  { %v2877_v21 = vadd.f32 %v1865_v32, %v1179_v33  ;;  %v2358_v37 = vpop.f32.mrb[3].mxu1 }
 0x27b   :  { %v1183_v56 = vmax.f32 %v2877_v21, 0.0 }
 0x27d   :  { %v3610_v6 = vand.u32 4294901760, %v1183_v56 }
 0x27f   :  { %v1289_v43 = vsub.f32 %v1183_v56, %v3610_v6 }
 0x281   :  { %v1290_v50 = vand.u32 4294901760, %v1289_v43 }
 0x283   :  { %v1291_v20 = vsub.f32 %v1289_v43, %v1290_v50 }
 0x285   :  { %v1292_v5 = vand.u32 4294901760, %v1291_v20 }
 0x287   :  { %2392 = vmatmul.mubr.f32.vlgmr.msra.gmra.mrb[2].mxu0 %v1292_v5 }
 0x288   :  { %2757 = vmatpush3.bf16.msra.mxu0 %v3535_v31  ;;  %2426 = vmatprep.mubr.msk.f32.mxu0 %vm2936_vm1, %v2937_v9  ;;  %v2828_v31 = vpack.c.bf16 %v1308_v34, %v1301_v38 }
 0x289   :  { %2758 = vmatprep.subr.bf16.mxu0 %v2935_v3 }
 0x28c   :  { %2760 = vmatpush3.bf16.msra.mxu0 %v2759_v45  ;;  %v2831_v45 = vpack.c.bf16 %v1322_v30, %v1315_v13 }
 0x28d   :  { %2761 = vmatprep.subr.bf16.mxu0 %v2935_v3 }
 0x290   :  { %2763 = vmatpush3.bf16.msra.mxu0 %v2762_v14 }
 0x291   :  { %2764 = vmatprep.subr.bf16.mxu0 %v2935_v3 }
 0x294   :  { %2766 = vmatpush3.bf16.msra.mxu0 %v2765_v59 }
 0x295   :  { %2767 = vmatprep.subr.bf16.mxu0 %v2935_v3 }
 0x298   :  { %2769 = vmatpush3.bf16.msra.mxu0 %v2768_v28 }
 0x299   :  { %2770 = vmatprep.subr.bf16.mxu0 %v2935_v3 }
 0x29c   :  { %2772 = vmatpush3.bf16.msra.mxu0 %v2771_v25 }
 0x29d   :  { %2773 = vmatprep.subr.bf16.mxu0 %v2935_v3 }
 0x2a0   :  { %2775 = vmatpush3.bf16.msra.mxu0 %v2774_v19 }
 0x2a1   :  { %2776 = vmatprep.subr.bf16.mxu0 %v2935_v3 }
 0x2a4   :  { %2778 = vmatpush3.bf16.msra.mxu0 %v2777_v12 }
 0x2a5   :  { %2779 = vmatprep.subr.bf16.mxu0 %v2935_v3 }
 0x2a7   :  { %2427 = vmatmul.mubr.f32.vlgmr.msra.gmra.mrb[2].mxu0 %v3610_v6 }
 0x2a8   :  { %2781 = vmatpush3.bf16.msra.mxu0 %v2780_v22  ;;  %2461 = vmatprep.mubr.msk.f32.mxu0 %vm2936_vm1, %v2937_v9 }
 0x2a9   :  { %2782 = vmatprep.subr.bf16.mxu0 %v2935_v3 }
 0x2ac   :  { %2784 = vmatpush3.bf16.msra.mxu0 %v2783_v23 }
 0x2ad   :  { %2785 = vmatprep.subr.bf16.mxu0 %v2935_v3 }
 0x2b0   :  { %2787 = vmatpush3.bf16.msra.mxu0 %v2786_v29 }
 0x2b1   :  { %2788 = vmatprep.subr.bf16.mxu0 %v2935_v3 }
 0x2b4   :  { %2790 = vmatpush3.bf16.msra.mxu0 %v2789_v42 }
 0x2b5   :  { %2791 = vmatprep.subr.bf16.mxu0 %v2935_v3 }
 0x2b8   :  { %2793 = vmatpush3.bf16.msra.mxu0 %v2792_v51 }
 0x2b9   :  { %2794 = vmatprep.subr.bf16.mxu0 %v2935_v3 }
 0x2bc   :  { %2796 = vmatpush3.bf16.msra.mxu0 %v2795_v60 }
 0x2bd   :  { %2797 = vmatprep.subr.bf16.mxu0 %v2935_v3 }
 0x2c0   :  { %2799 = vmatpush3.bf16.msra.mxu0 %v2798_v36 }
 0x2c1   :  { %2800 = vmatprep.subr.bf16.mxu0 %v2935_v3 }
 0x2c4   :  { %2802 = vmatpush3.bf16.msra.mxu0 %v2801_v18 }
 0x2c5   :  { %2803 = vmatprep.subr.bf16.mxu0 %v2935_v3 }
 0x2c7   :  { %2462 = vmatmul.mubr.f32.vlgmr.msra.gmra.mrb[2].mxu0 %v1289_v43 }
 0x2c8   :  { %2805 = vmatpush3.bf16.msra.mxu0 %v3330_v1  ;;  %2496 = vmatprep.mubr.msk.f32.mxu0 %vm2936_vm1, %v2937_v9 }
 0x2c9   :  { %2806 = vmatprep.subr.bf16.mxu0 %v2935_v3 }
 0x2cc   :  { %2808 = vmatpush3.bf16.msra.mxu0 %v3341_v55 }
 0x2cd   :  { %2809 = vmatprep.subr.bf16.mxu0 %v2935_v3 }
 0x2d0   :  { %2811 = vmatpush3.bf16.msra.mxu0 %v3367_v11 }
 0x2d1   :  { %2812 = vmatprep.subr.bf16.mxu0 %v2935_v3 }
 0x2d4   :  { %2814 = vmatpush3.bf16.msra.mxu0 %v3375_v2 }
 0x2d5   :  { %2815 = vmatprep.subr.bf16.mxu0 %v2935_v3 }
 0x2d8   :  { %2817 = vmatpush3.bf16.msra.mxu0 %v3383_v16 }
 0x2d9   :  { %2818 = vmatprep.subr.bf16.mxu0 %v2935_v3 }
 0x2dc   :  { %2820 = vmatpush3.bf16.msra.mxu0 %v3489_v0 }
 0x2dd   :  { %2821 = vmatprep.subr.bf16.mxu0 %v2935_v3 }
 0x2e0   :  { %2823 = vmatpush3.bf16.msra.mxu0 %v3499_v24 }
 0x2e1   :  { %2824 = vmatprep.subr.bf16.mxu0 %v2935_v3 }
 0x2e4   :  { %2826 = vmatpush3.bf16.msra.mxu0 %v3511_v41 }
 0x2e5   :  { %2827 = vmatprep.subr.bf16.mxu0 %v2935_v3 }
 0x2e7   :  { %2497 = vmatmul.mubr.f32.vlgmr.msra.gmra.mrb[2].mxu0 %v1290_v50 }
 0x2e8   :  { %2829 = vmatpush3.bf16.msra.mxu0 %v2828_v31  ;;  %2531 = vmatprep.mubr.msk.f32.mxu0 %vm2936_vm1, %v2937_v9 }
 0x2e9   :  { %2830 = vmatprep.subr.bf16.mxu0 %v2935_v3 }
 0x2ec   :  { %2832 = vmatpush3.bf16.msra.mxu0 %v2831_v45 }
 0x2ed   :  { %2833 = vmatprep.subr.bf16.mxu0 %v2935_v3 }
 0x2f0   :  { %2835 = vmatpush3.bf16.msra.mxu0 %v2834_v7 }
 0x2f1   :  { %2836 = vmatprep.subr.bf16.mxu0 %v2935_v3 }
 0x2f4   :  { %2838 = vmatpush3.bf16.msra.mxu0 %v2837_v54 }
 0x2f5   :  { %2839 = vmatprep.subr.bf16.mxu0 %v2935_v3 }
 0x2f8   :  { %2841 = vmatpush3.bf16.msra.mxu0 %v2840_v4 }
 0x2f9   :  { %2842 = vmatprep.subr.bf16.mxu0 %v2935_v3 }
 0x2fc   :  { %2844 = vmatpush3.bf16.msra.mxu0 %v2843_v44 }
 0x2fd   :  { %2845 = vmatprep.subr.bf16.mxu0 %v2935_v3 }
 0x300   :  { %2847 = vmatpush3.bf16.msra.mxu0 %v2846_v15 }
 0x301   :  { %2848 = vmatprep.subr.bf16.mxu0 %v2935_v3 }
 0x304   :  { %2850 = vmatpush3.bf16.msra.mxu0 %v2849_v61 }
 0x305   :  { %2851 = vmatprep.subr.bf16.mxu0 %v2935_v3 }
 0x307   :  { %2532 = vmatmul.mubr.f32.vlgmr.msra.gmra.mrb[2].mxu0 %v3610_v6 }
 0x308   :  { %2853 = vmatpush3.bf16.msra.mxu0 %v3330_v1  ;;  %2566 = vmatprep.mubr.msk.f32.mxu0 %vm2936_vm1, %v2937_v9  ;;  %v1866_v9 = vld [vmem:[%s3735_s6] ss:$0 sm:$0xff] }
 0x309   :  { %2854 = vmatprep.subr.bf16.mxu0 %v2935_v3 }
 0x30c   :  { %2856 = vmatpush3.bf16.msra.mxu0 %v3341_v55 }
 0x30d   :  { %2857 = vmatprep.subr.bf16.mxu0 %v2935_v3 }
 0x310   :  { %2859 = vmatpush3.bf16.msra.mxu0 %v3367_v11 }
 0x311   :  { %2860 = vmatprep.subr.bf16.mxu0 %v2935_v3 }
 0x314   :  { %2862 = vmatpush3.bf16.msra.mxu0 %v3375_v2 }
 0x315   :  { %2863 = vmatprep.subr.bf16.mxu0 %v2935_v3 }
 0x318   :  { %2865 = vmatpush3.bf16.msra.mxu0 %v3383_v16 }
 0x319   :  { %2866 = vmatprep.subr.bf16.mxu0 %v2935_v3 }
 0x31c   :  { %2868 = vmatpush3.bf16.msra.mxu0 %v3489_v0 }
 0x31d   :  { %2869 = vmatprep.subr.bf16.mxu0 %v2935_v3 }
 0x320   :  { %2871 = vmatpush3.bf16.msra.mxu0 %v3499_v24 }
 0x321   :  { %2872 = vmatprep.subr.bf16.mxu0 %v2935_v3 }
 0x324   :  { %2874 = vmatpush3.bf16.msra.mxu0 %v3511_v41 }
 0x327   :  { %2567 = vmatmul.mubr.f32.vlgmr.msra.gmra.mrb[2].mxu0 %v3610_v6 }
 0x3fa   :  { %v1844_v55 = vpop.f32.mrb[2].mxu0 }
 0x3fb   :  { %v2878_v1 = vadd.f32 %v1866_v9, %v1844_v55  ;;  %v2568_v11 = vpop.f32.mrb[3].mxu0 }
 0x3fd   :  { %1849 = vst.msk [vmem:[#allocation2] sm:$0xff] %vm1848_vm3, %v2878_v1 }
 0x3fe   :  { %2922 = shalt.err (!%p2919_p4)
}
 0x3ff   :  { %s2923_s26 = scalar_lea.hbm %s3736_s7, 128 }
 0x400   :  { %p2924_p5 = scmp.ne.s32.totalorder %s3736_s7, %s2923_s26  ;;  %p2927_p6 = scmp.lt.u32.totalorder %s2923_s26, %s3736_s7 }
 0x402   :  { %p2929_p7 = pnand %p2927_p6, %p2924_p5 }
 0x404   :  { %2932 = shalt.err (!%p2929_p7)
}
 0x405   :  { %1859 = dma.vmem_to_hbm [thread:$0]  %s1857_s22, 128, %s3736_s7, [#allocation3]  }
 0x406   :  { %2933 = dma.done.wait [#allocation3], 128  }
 0x407   :  { %2934 = vsyncadd [#allocation3], 4294967168 }
 0x408   :  { %1863 = vsyncpa [#allocation3], 1 }

</bundles_post_ra>
